<compile_context>
chip_gen: v6e
topology: v6e:2x2x1
jax: 0.10.0
libtpu: 0.0.40
codegen_flags: <defaults>
</compile_context>

<pallas_src>
import functools
import math

import jax
import jax.numpy as jnp
import numpy as np
from jax.experimental import pallas as pl
from jax.experimental.pallas import tpu as pltpu

_MASK_VAL = -1e30  # large finite negative instead of -inf: keeps max/exp NaN-free


def _sdpa_kernel(*refs, scale, has_mask, mm_dtype):
    if has_mask:
        q_ref, k_ref, v_ref, mask_ref, out_ref, attn_ref = refs
    else:
        q_ref, k_ref, v_ref, out_ref, attn_ref = refs
        mask_ref = None

    # Fold 1/sqrt(d_k) into the small (tq, d_k) q tile; the scale multiply runs in
    # f32 (exact) and only then casts to the MXU operand dtype.
    q = (q_ref[...].astype(jnp.float32) * scale).astype(mm_dtype)
    k = k_ref[...].astype(mm_dtype)

    # scores = q @ k^T, contracting the last dims directly (no k.T / XLU transpose).
    scores = jax.lax.dot_general(
        q, k,
        dimension_numbers=(((1,), (1,)), ((), ())),
        preferred_element_type=jnp.float32,
    )                                            # (tq, T_k) f32

    if has_mask:
        m = mask_ref[...] != 0                   # (tq, T_k) bool, from int8
        scores = jnp.where(m, jnp.float32(_MASK_VAL), scores)

    # Numerically stable softmax along the key axis. For partially masked rows the
    # masked entries are exp(~-1e30 - mx) == 0 exactly, so no second full-tile
    # select is needed; fully masked rows get a (tq, 1) column fix-up below.
    mx = jnp.max(scores, axis=-1, keepdims=True)
    e = jnp.exp(scores - mx)                     # (tq, T_k) f32
    s = jnp.sum(e, axis=-1, keepdims=True)       # (tq, 1)

    # EUP reciprocal + one Newton step on the (tq, 1) column -> ~f32-exact 1/s,
    # replacing a full (tq, T_k) VPU divide.
    s_safe = jnp.maximum(s, jnp.float32(1e-30))
    inv = pl.reciprocal(s_safe, approx=True)
    inv = inv * (2.0 - s_safe * inv)
    if has_mask:
        # Fully masked rows (mx == _MASK_VAL) must come out exactly 0, matching
        # PyTorch's softmax(-inf row) -> NaN -> masked_fill(0) behaviour.
        inv = jnp.where(mx <= jnp.float32(0.5 * _MASK_VAL), jnp.float32(0.0), inv)

    attn = e * inv                               # (tq, T_k) f32

    # output = attn @ v (operands in mm_dtype, f32 accumulation).
    out = jnp.dot(attn.astype(mm_dtype), v_ref[...].astype(mm_dtype),
                  preferred_element_type=jnp.float32)

    attn_ref[...] = attn.astype(attn_ref.dtype)
    out_ref[...] = out.astype(out_ref.dtype)


def _physical_vmem_bytes():
    """Per-TensorCore VMEM capacity; conservative fallback if the query fails."""
    try:
        info = pltpu.get_tpu_info()
        cap = getattr(info, "vmem_capacity_bytes", None)
        if cap:
            return int(cap)
    except Exception:
        pass
    return 64 * 1024 * 1024  # v7x-sized fallback (safe on all generations)


def scaled_dot_product_attention(q, k, v, mask=None, *, attn_dtype=None,
                                 use_bf16_matmul=False):
    """Pallas implementation of ScaledDotProductAttention.forward.

    q: (B, T_q, d_k), k: (B, T_k, d_k), v: (B, T_k, d_v),
    mask: optional bool/int of shape (B, T_q, T_k), (1, T_q, T_k) or (T_q, T_k);
          True/nonzero = masked out.
    Returns (output (B, T_q, d_v), attn (B, T_q, T_k)).
    """
    B, T_q, d_k = q.shape
    _, T_k, d_k2 = k.shape
    _, T_v, d_v = v.shape
    assert d_k == d_k2, "keys & queries must have same dimension"
    assert T_k == T_v, "T_k = T_v"

    has_mask = mask is not None
    attn_dtype = q.dtype if attn_dtype is None else jnp.dtype(attn_dtype)
    mm_dtype = jnp.bfloat16 if use_bf16_matmul else q.dtype
    scale = 1.0 / math.sqrt(d_k)

    itemsize = jnp.dtype(q.dtype).itemsize
    attn_itemsize = jnp.dtype(attn_dtype).itemsize

    # ---- generation-aware VMEM budgeting --------------------------------------
    cap = _physical_vmem_bytes()                       # 128 MiB v5e/v6e, 64 MiB v7x
    base_limit = min(cap * 5 // 8, 64 * 1024 * 1024)   # ~64 MiB v5e/v6e, ~40 MiB v7x
    budget = base_limit * 3 // 4                       # ~48 MiB / ~30 MiB soft budget

    def est_bytes(tq):
        # double-buffered input blocks + double-buffered outputs + f32 temporaries
        inb = 2 * itemsize * (tq * d_k + T_k * d_k + T_k * d_v)
        if has_mask:
            inb += 2 * 1 * tq * T_k
        outb = 2 * (itemsize * tq * d_v + attn_itemsize * tq * T_k)
        tmp = 4 * 4 * tq * T_k
        return inb + outb + tmp

    def choose_tq():
        if est_bytes(T_q) <= budget:
            return T_q
        # Descending candidates: the largest fitting tile wins, so MXU-filling
        # tiles (512/256 for the 256-wide v6e/v7x MXU, 128 for v5e) are preferred.
        cands = [c for c in (1024, 512, 256, 128, 64, 32, 16, 8)
                 if c < T_q and T_q % c == 0]
        for c in cands:
            if est_bytes(c) <= budget:
                return c
        # Nothing fits the soft budget (very long T_k): take the smallest legal
        # divisor and raise vmem_limit_bytes below instead of going monolithic.
        return cands[-1] if cands else T_q

    tq = choose_tq()
    n_q = T_q // tq
    vmem_limit = max(base_limit, min(est_bytes(tq) * 5 // 4, cap * 9 // 10))

    kernel = functools.partial(_sdpa_kernel, scale=scale, has_mask=has_mask,
                               mm_dtype=mm_dtype)

    # Leading size-1 batch dim squeezed (None) -> kernel sees 2-D refs. K/V block
    # index only changes with b, so they are fetched once per batch step.
    in_specs = [
        pl.BlockSpec((None, tq, d_k), lambda b, i: (b, i, 0)),
        pl.BlockSpec((None, T_k, d_k), lambda b, i: (b, 0, 0)),
        pl.BlockSpec((None, T_k, d_v), lambda b, i: (b, 0, 0)),
    ]
    inputs = [q, k, v]
    if has_mask:
        if mask.ndim == 2:
            mask = mask[None]
        if mask.dtype != jnp.int8:
            mask = (mask != 0).astype(jnp.int8)    # 1 byte/elem on the wire
        if mask.shape[0] == 1 and B > 1:
            # Mask shared across batch: DMA the single copy (no B-fold HBM reads).
            in_specs.append(pl.BlockSpec((None, tq, T_k), lambda b, i: (0, i, 0)))
        else:
            in_specs.append(pl.BlockSpec((None, tq, T_k), lambda b, i: (b, i, 0)))
        inputs.append(mask)

    # v7x megacore: shard the two TensorCores over batch so each core fetches K/V
    # for its own batches only; for B == 1 shard over q tiles instead.
    dim_sem = ("parallel", "arbitrary") if B >= 2 else ("arbitrary", "parallel")

    out, attn = pl.pallas_call(
        kernel,
        out_shape=(
            jax.ShapeDtypeStruct((B, T_q, d_v), q.dtype),
            jax.ShapeDtypeStruct((B, T_q, T_k), attn_dtype),
        ),
        grid_spec=pltpu.PrefetchScalarGridSpec(
            num_scalar_prefetch=0,
            grid=(B, n_q),
            in_specs=in_specs,
            out_specs=[
                pl.BlockSpec((None, tq, d_v), lambda b, i: (b, i, 0)),
                pl.BlockSpec((None, tq, T_k), lambda b, i: (b, i, 0)),
            ],
        ),
        compiler_params=pltpu.CompilerParams(
            dimension_semantics=dim_sem,
            vmem_limit_bytes=int(vmem_limit),
        ),
    )(*inputs)
    return out, attn


def _reference(q, k, v, mask=None):
    d_k = q.shape[-1]
    scores = jnp.einsum("bqd,bkd->bqk", q, k) / np.sqrt(d_k)
    if mask is not None:
        scores = jnp.where(mask, -jnp.inf, scores)
    attn = jax.nn.softmax(scores, axis=-1)
    attn = jnp.where(jnp.isnan(attn), 0.0, attn)
    out = jnp.einsum("bqk,bkd->bqd", attn, v)
    return out, attn


if __name__ == "__main__":
    key = jax.random.PRNGKey(0)
    B, T_q, T_k, d_k, d_v = 2, 8, 8, 32, 32
    kq, kk, kv = jax.random.split(key, 3)
    q = jax.random.normal(kq, (B, T_q, d_k), dtype=jnp.float32)
    k = jax.random.normal(kk, (B, T_k, d_k), dtype=jnp.float32)
    v = jax.random.normal(kv, (B, T_k, d_v), dtype=jnp.float32)

    # Causal-style mask to exercise the masked_fill path (per-batch copies).
    mask = jnp.triu(jnp.ones((T_q, T_k), dtype=bool), k=1)[None].repeat(B, axis=0)

    out, attn = scaled_dot_product_attention(q, k, v, mask)
    jax.block_until_ready((out, attn))
    ref_out, ref_attn = _reference(q, k, v, mask)
    np.testing.assert_allclose(np.asarray(out), np.asarray(ref_out), atol=1e-4, rtol=1e-4)
    np.testing.assert_allclose(np.asarray(attn), np.asarray(ref_attn), atol=1e-4, rtol=1e-4)

    # Fully-masked row: PyTorch's isnan fixup yields attn == 0 -> output row == 0.
    mask_full = mask.at[:, 0, :].set(True)
    out_f, attn_f = scaled_dot_product_attention(q, k, v, mask_full)
    jax.block_until_ready((out_f, attn_f))
    ref_out_f, ref_attn_f = _reference(q, k, v, mask_full)
    np.testing.assert_allclose(np.asarray(out_f), np.asarray(ref_out_f), atol=1e-4, rtol=1e-4)
    np.testing.assert_allclose(np.asarray(attn_f), np.asarray(ref_attn_f), atol=1e-4, rtol=1e-4)

    # Broadcast mask (shared across batch) -> single-copy DMA path.
    mask_b = jnp.triu(jnp.ones((T_q, T_k), dtype=bool), k=1)[None]
    out_b, attn_b = scaled_dot_product_attention(q, k, v, mask_b)
    jax.block_until_ready((out_b, attn_b))
    ref_out_b, ref_attn_b = _reference(q, k, v, jnp.broadcast_to(mask_b, (B, T_q, T_k)))
    np.testing.assert_allclose(np.asarray(out_b), np.asarray(ref_out_b), atol=1e-4, rtol=1e-4)
    np.testing.assert_allclose(np.asarray(attn_b), np.asarray(ref_attn_b), atol=1e-4, rtol=1e-4)

    # mask=None path (no mask operand is DMA'd at all).
    out2, attn2 = scaled_dot_product_attention(q, k, v, None)
    jax.block_until_ready((out2, attn2))
    ref_out2, ref_attn2 = _reference(q, k, v, None)
    np.testing.assert_allclose(np.asarray(out2), np.asarray(ref_out2), atol=1e-4, rtol=1e-4)
    np.testing.assert_allclose(np.asarray(attn2), np.asarray(ref_attn2), atol=1e-4, rtol=1e-4)

    # Optional bf16-MXU fast path (f32 accumulation) -- looser tolerance.
    out3, attn3 = scaled_dot_product_attention(q, k, v, mask, use_bf16_matmul=True)
    jax.block_until_ready((out3, attn3))
    np.testing.assert_allclose(np.asarray(out3), np.asarray(ref_out), atol=5e-2, rtol=5e-2)
    np.testing.assert_allclose(np.asarray(attn3), np.asarray(ref_attn), atol=5e-2, rtol=5e-2)

    print("KERNEL_OK")
</pallas_src>

<mosaic_0001>
module attributes {stable_mosaic.version = 11 : i64} {
  func.func @_sdpa_kernel(%arg0: i32, %arg1: i32, %arg2: memref<1x8x32xf32, #tpu.memory_space<vmem>>, %arg3: memref<1x8x32xf32, #tpu.memory_space<vmem>>, %arg4: memref<1x8x32xf32, #tpu.memory_space<vmem>>, %arg5: memref<1x8x8xi8, #tpu.memory_space<vmem>>, %arg6: memref<1x8x32xf32, #tpu.memory_space<vmem>>, %arg7: memref<1x8x8xf32, #tpu.memory_space<vmem>>) attributes {dimension_semantics = [#tpu.dimension_semantics<parallel>, #tpu.dimension_semantics<arbitrary>], iteration_bounds = array<i64: 2, 1>, scalar_prefetch = 0 : i64, scratch_operands = 0 : i64, tpu.core_type = #tpu.core_type<tc>, window_params = [{transform_indices = @transform_0, window_bounds = array<i64: 1, 8, 32>}, {transform_indices = @transform_1, window_bounds = array<i64: 1, 8, 32>}, {transform_indices = @transform_2, window_bounds = array<i64: 1, 8, 32>}, {transform_indices = @transform_3, window_bounds = array<i64: 1, 8, 8>}, {transform_indices = @transform_4, window_bounds = array<i64: 1, 8, 32>}, {transform_indices = @transform_5, window_bounds = array<i64: 1, 8, 8>}]} {
    %c0 = arith.constant 0 : index
    %c0_0 = arith.constant 0 : index
    %c0_1 = arith.constant 0 : index
    %0 = vector.load %arg2[%c0, %c0_0, %c0_1] : memref<1x8x32xf32, #tpu.memory_space<vmem>>, vector<1x8x32xf32>
    %1 = vector.shape_cast %0 : vector<1x8x32xf32> to vector<8x32xf32>
    %cst = arith.constant 0.176776692 : f32
    %2 = vector.broadcast %cst : f32 to vector<8x32xf32>
    %3 = arith.mulf %1, %2 : vector<8x32xf32>
    %c0_2 = arith.constant 0 : index
    %c0_3 = arith.constant 0 : index
    %c0_4 = arith.constant 0 : index
    %4 = vector.load %arg3[%c0_2, %c0_3, %c0_4] : memref<1x8x32xf32, #tpu.memory_space<vmem>>, vector<1x8x32xf32>
    %5 = vector.shape_cast %4 : vector<1x8x32xf32> to vector<8x32xf32>
    %cst_5 = arith.constant dense<0.000000e+00> : vector<8x8xf32>
    %6 = tpu.matmul %3, %5, %cst_5 {dimension_numbers = #tpu.dot_dimension_numbers<[1], [1], [0], [0], [0, 0, 1, 0], [], []>} : vector<8x32xf32>, vector<8x32xf32>, vector<8x8xf32> -> vector<8x8xf32>
    %c0_6 = arith.constant 0 : index
    %c0_7 = arith.constant 0 : index
    %c0_8 = arith.constant 0 : index
    %7 = vector.load %arg5[%c0_6, %c0_7, %c0_8] : memref<1x8x8xi8, #tpu.memory_space<vmem>>, vector<1x8x8xi8>
    %8 = vector.shape_cast %7 : vector<1x8x8xi8> to vector<8x8xi8>
    %c0_i8 = arith.constant 0 : i8
    %9 = vector.broadcast %c0_i8 : i8 to vector<8x8xi8>
    %10 = arith.cmpi ne, %8, %9 : vector<8x8xi8>
    %cst_9 = arith.constant -1.000000e+30 : f32
    %11 = vector.broadcast %cst_9 : f32 to vector<8x8xf32>
    %12 = arith.select %10, %11, %6 : vector<8x8xi1>, vector<8x8xf32>
    %cst_10 = arith.constant dense<0xFF800000> : vector<8xf32>
    %13 = vector.multi_reduction <maximumf>, %12, %cst_10 [1] : vector<8x8xf32> to vector<8xf32>
    %14 = vector.shape_cast %13 : vector<8xf32> to vector<8x1xf32>
    %15 = vector.broadcast %14 : vector<8x1xf32> to vector<8x8xf32>
    %16 = arith.subf %12, %15 : vector<8x8xf32>
    %17 = math.exp %16 : vector<8x8xf32>
    %cst_11 = arith.constant dense<0.000000e+00> : vector<8xf32>
    %18 = vector.multi_reduction <add>, %17, %cst_11 [1] : vector<8x8xf32> to vector<8xf32>
    %19 = vector.shape_cast %18 : vector<8xf32> to vector<8x1xf32>
    %cst_12 = arith.constant 1.000000e-30 : f32
    %20 = vector.broadcast %cst_12 : f32 to vector<8x1xf32>
    %21 = arith.maximumf %19, %20 : vector<8x1xf32>
    %22 = tpu.reciprocal %21 {approx = true} : vector<8x1xf32> -> vector<8x1xf32>
    %23 = arith.mulf %21, %22 : vector<8x1xf32>
    %cst_13 = arith.constant 2.000000e+00 : f32
    %24 = vector.broadcast %cst_13 : f32 to vector<8x1xf32>
    %25 = arith.subf %24, %23 : vector<8x1xf32>
    %26 = arith.mulf %22, %25 : vector<8x1xf32>
    %cst_14 = arith.constant -5.000000e+29 : f32
    %27 = vector.broadcast %cst_14 : f32 to vector<8x1xf32>
    %28 = arith.cmpf ole, %14, %27 : vector<8x1xf32>
    %cst_15 = arith.constant 0.000000e+00 : f32
    %29 = vector.broadcast %cst_15 : f32 to vector<8x1xf32>
    %30 = arith.select %28, %29, %26 : vector<8x1xi1>, vector<8x1xf32>
    %31 = vector.broadcast %30 : vector<8x1xf32> to vector<8x8xf32>
    %32 = arith.mulf %17, %31 : vector<8x8xf32>
    %c0_16 = arith.constant 0 : index
    %c0_17 = arith.constant 0 : index
    %c0_18 = arith.constant 0 : index
    %33 = vector.load %arg4[%c0_16, %c0_17, %c0_18] : memref<1x8x32xf32, #tpu.memory_space<vmem>>, vector<1x8x32xf32>
    %34 = vector.shape_cast %33 : vector<1x8x32xf32> to vector<8x32xf32>
    %cst_19 = arith.constant dense<0.000000e+00> : vector<8x32xf32>
    %35 = tpu.matmul %32, %34, %cst_19 {dimension_numbers = #tpu.dot_dimension_numbers<[1], [0], [0], [1], [0, 0, 1, 1], [], []>} : vector<8x8xf32>, vector<8x32xf32>, vector<8x32xf32> -> vector<8x32xf32>
    %c0_20 = arith.constant 0 : index
    %c0_21 = arith.constant 0 : index
    %c0_22 = arith.constant 0 : index
    %36 = vector.load %arg7[%c0_20, %c0_21, %c0_22] : memref<1x8x8xf32, #tpu.memory_space<vmem>>, vector<1x8x8xf32>
    %37 = vector.shape_cast %36 : vector<1x8x8xf32> to vector<8x8xf32>
    %38 = vector.shape_cast %32 : vector<8x8xf32> to vector<1x8x8xf32>
    tpu.vector_store %arg7[%c0_20, %c0_21, %c0_22], %38 {strides = array<i32>} : memref<1x8x8xf32, #tpu.memory_space<vmem>>, vector<1x8x8xf32>,
    %c0_23 = arith.constant 0 : index
    %c0_24 = arith.constant 0 : index
    %c0_25 = arith.constant 0 : index
    %39 = vector.load %arg6[%c0_23, %c0_24, %c0_25] : memref<1x8x32xf32, #tpu.memory_space<vmem>>, vector<1x8x32xf32>
    %40 = vector.shape_cast %39 : vector<1x8x32xf32> to vector<8x32xf32>
    %41 = vector.shape_cast %35 : vector<8x32xf32> to vector<1x8x32xf32>
    tpu.vector_store %arg6[%c0_23, %c0_24, %c0_25], %41 {strides = array<i32>} : memref<1x8x32xf32, #tpu.memory_space<vmem>>, vector<1x8x32xf32>,
    return
  }
  func.func @transform_0(%arg0: i32, %arg1: i32) -> (i32, i32, i32) {
    %c0_i32 = arith.constant 0 : i32
    %c0_i32_0 = arith.constant 0 : i32
    return %arg0, %arg1, %c0_i32 : i32, i32, i32
  }
  func.func @transform_1(%arg0: i32, %arg1: i32) -> (i32, i32, i32) {
    %c0_i32 = arith.constant 0 : i32
    %c0_i32_0 = arith.constant 0 : i32
    %c0_i32_1 = arith.constant 0 : i32
    return %arg0, %c0_i32, %c0_i32_0 : i32, i32, i32
  }
  func.func @transform_2(%arg0: i32, %arg1: i32) -> (i32, i32, i32) {
    %c0_i32 = arith.constant 0 : i32
    %c0_i32_0 = arith.constant 0 : i32
    %c0_i32_1 = arith.constant 0 : i32
    return %arg0, %c0_i32, %c0_i32_0 : i32, i32, i32
  }
  func.func @transform_3(%arg0: i32, %arg1: i32) -> (i32, i32, i32) {
    %c0_i32 = arith.constant 0 : i32
    %c0_i32_0 = arith.constant 0 : i32
    return %arg0, %arg1, %c0_i32 : i32, i32, i32
  }
  func.func @transform_4(%arg0: i32, %arg1: i32) -> (i32, i32, i32) {
    %c0_i32 = arith.constant 0 : i32
    %c0_i32_0 = arith.constant 0 : i32
    return %arg0, %arg1, %c0_i32 : i32, i32, i32
  }
  func.func @transform_5(%arg0: i32, %arg1: i32) -> (i32, i32, i32) {
    %c0_i32 = arith.constant 0 : i32
    %c0_i32_0 = arith.constant 0 : i32
    return %arg0, %arg1, %c0_i32 : i32, i32, i32
  }
}

</mosaic_0001>

<bundles_post_ra>
// kernel: tpu_custom_call.1
= control target key start
LH: loop header
LB: loop body
LE: loop exit
PB: predicated region body
PF: predicated region fallthrough
CT: control target
= control target key end

     0   :  { %s1361_s0 = inlined_call_operand.hbm [shape: f32[2,8,32], index: 0, kind: input, shape index: {}]   ;;  %s1362_s1 = inlined_call_operand.hbm [shape: f32[2,8,32], index: 1, kind: input, shape index: {}]   ;;  %s1363_s2 = inlined_call_operand.hbm [shape: f32[2,8,32], index: 2, kind: input, shape index: {}]   ;;  %s1364_s3 = inlined_call_operand.vmem [shape: s8[2,8,8], index: 3, kind: input, shape index: {}]   ;;  %s1365_s4 = inlined_call_operand.hbm [shape: f32[2,8,32], index: 4, kind: output, shape index: {0}]   ;;  %s1366_s5 = inlined_call_operand.hbm [shape: f32[2,8,8], index: 5, kind: output, shape index: {1}]  }
   0x1   :  { %1372 = sst [smem:[#allocation19_spill]] %s1362_s1 }
   0x2   :  { %11 = vsyncpa [#allocation3], 0 }
   0x3   :  { %13 = vsyncpa [#allocation3 + $0x1], 0 }
   0x4   :  { %14 = vsyncpa [#allocation6], 0 }
   0x5   :  { %16 = vsyncpa [#allocation6 + $0x1], 0 }
   0x6   :  { %17 = vsyncpa [#allocation4], 0 }
   0x7   :  { %19 = vsyncpa [#allocation4 + $0x1], 0 }
   0x8   :  { %20 = vsyncpa [#allocation10], 0 }
   0x9   :  { %22 = vsyncpa [#allocation10 + $0x1], 0  ;;  %s1118_s18 = smov 0   ;;  %s1120_s19 = smov 0  }
   0xa   :  { %s1122_s20 = smov 0   ;;  %s1124_s21 = smov 0  }
   0xb   :  { %s1126_s22 = smov 0   ;;  %s1128_s23 = smov 0  }
   0xc LB: > { %1373 = sst [smem:[#allocation15_spill]] %s1074_s22  ;;  %s1149_s24 = sadd.s32 4294967295, %s1078_s23   ;;  %s1078_s23 = sphi %s1128_s23, %s28_s23   ;;  %s1074_s22 = sphi %s1126_s22, %s1389_s22   ;;  %s1070_s21 = sphi %s1124_s21, %s1388_s21   ;;  %s1066_s20 = sphi %s1122_s20, %s1392_s20   ;;  %s1062_s19 = sphi %s1120_s19, %s1391_s19   ;;  %s1058_s18 = sphi %s1118_s18, %s1390_s18  }
   0xd   : > { %1374 = sst [smem:[#allocation16_spill]] %s1078_s23  ;;  %s757_s25 = sadd.s32 4294967294, %s1078_s23  }
   0xe   : > { %s40_s26 = sadd.s32 1, %s1074_s22  ;;  %s49_s27 = sadd.s32 1, %s1066_s20 }
   0xf   : > { %p42_p0 = scmp.ge.s32.totalorder %s40_s26, 2  ;;  %p56_p1 = scmp.ne.s32.totalorder %s1066_s20, %s1062_s19 }
  0x10   : > { %p57_p2 = scmp.eq.s32.totalorder %s1078_s23, 0  ;;  %p62_p3 = scmp.ne.s32.totalorder %s1062_s19, %s1058_s18 }
  0x11   : > { %s1394_s26 = smov (%p42_p0, %s40_s26), 0  ;;  %p63_p5 = scmp.eq.s32.totalorder %s1149_s24, 0 }
  0x12   : > { %1375 = sst [smem:[#allocation17_spill]] %s1394_s26  ;;  %p1161_p4 = por %p57_p2, %p56_p1 }
  0x13   : > { %s44_s29 = ssub.s32 %s1074_s22, %s1394_s26  ;;  %p168_p6 = scmp.eq.s32.totalorder %s1149_s24, 1 }
  0x14   : > { %p47_p7 = scmp.eq.s32.totalorder %s44_s29, 0  ;;  %p1169_p8 = por %p63_p5, %p62_p3 }
  0x15   : > { %p1173_p9 = por %p168_p6, %p56_p1  ;;  %p174_p10 = scmp.eq.s32.totalorder %s757_s25, 1 }
  0x16   : > { %s1178_s7 = scalar_select %p47_p7, %s1066_s20, %s49_s27  }
  0x17   : > { %p1180_p11 = por %p174_p10, %p62_p3  ;;  %p823_p13 = scmp.lt.s32.totalorder %s1078_s23, 2 }
  0x18   : > { %1379 = sst [smem:[#allocation18_spill]] %s1178_s7  ;;  %s1367_s9 = sand.u32 1, %s1066_s20  }
  0x19   : > { %s1189_s10 = sshll.u32 %s1367_s9, 3  ;;  %s1192_s11 = sshll.u32 %s1074_s22, 7 }
  0x1a   : > { %p1196_p0 = pnand %p823_p13, %p1161_p4  ;;  %s241_s13 = sand.u32 1, %s1078_s23  }
  0x1b   : > { %s1382_s1 = sld [smem:[#allocation19_spill]]  ;;  %s245_s17 = scalar_lea.vmem [#allocation5], %s1189_s10 }
  0x1c   : > { %s252_s25 = sshll.u32 %s245_s17, 4  ;;  %p766_p1 = scmp.ge.s32.totalorder %s1078_s23, 1  ;;  %s253_s25 = int_to_ptr.vmem [resolvable:$true] %s252_s25 }
  0x1d   : > { %p285_p2 = scmp.lt.s32.totalorder %s1078_s23, 3  ;;  %s1208_s27 = scalar_lea.sflag [#allocation6], %s241_s13 }
  0x1e   : > { %p882_p3 = pneg %p1196_p0  ;;  %s893_s28 = scalar_lea.vmem %s253_s25, 128 }
  0x1f   : > { %p894_p4 = scmp.ne.s32.totalorder %s253_s25, %s893_s28  ;;  %s1080_s29 = smov [#allocation5]  }
  0x20   : > { %s898_s9 = sshll.u32 %s1080_s29, 4  ;;  %s899_s9 = int_to_ptr.vmem [resolvable:$false] %s898_s9 }
  0x21   : > { %s250_s16 = scalar_lea.hbm %s1382_s1, %s1192_s11  ;;  %p896_p5 = pnand %p894_p4, %p882_p3 }
  0x22   : > { %s900_s14 = scalar_lea.vmem %s899_s9, 256  ;;  %p901_p7 = scmp.lt.s32.totalorder %s253_s25, %s899_s9 }
  0x23   : > { %p897_p6 = pneg %p896_p5  ;;  %p902_p10 = scmp.lt.s32.totalorder %s900_s14, %s893_s28 }
  0x25   : > { %p903_p13 = por %p902_p10, %p901_p7 }
  0x27   : > { %p904_p12 = pnand %p903_p13, %p897_p6 }
  0x29   : > { %907 = shalt.err (!%p904_p12)
}
  0x2a   : > { %812 = dma.hbm_to_vmem [thread:$0]  (!%p1196_p0), %s250_s16, 128, %s253_s25, %s1208_s27  }
  0x2b   : > { %p1222_p4 = pnand %p766_p1, %p285_p2  ;;  %s232_s17 = scalar_lea.hbm %s1361_s0, %s1192_s11 }
  0x2c   : > { %s226_s28 = scalar_lea.vmem [#allocation2], %s1189_s10  ;;  %s268_s26 = scalar_lea.hbm %s1363_s2, %s1192_s11 }
  0x2d   : > { %s234_s29 = sshll.u32 %s226_s28, 4  ;;  %s1384_s22 = sand.u32 1, %s1066_s20   ;;  %s235_s29 = int_to_ptr.vmem [resolvable:$true] %s234_s29 }
  0x2e   : > { %s223_s7 = scalar_lea.sflag [#allocation3], %s1384_s22  ;;  %s921_s16 = scalar_lea.vmem %s235_s29, 128 }
  0x2f   : > { %p922_p12 = scmp.ne.s32.totalorder %s235_s29, %s921_s16  ;;  %s1081_s25 = smov [#allocation2]  }
  0x30   : > { %s926_s23 = sshll.u32 %s1081_s25, 4  ;;  %s927_s23 = int_to_ptr.vmem [resolvable:$false] %s926_s23 }
  0x31   : > { %p924_p1 = pnand %p922_p12, %p882_p3  ;;  %s928_s9 = scalar_lea.vmem %s927_s23, 256 }
  0x32   : > { %p929_p5 = scmp.lt.s32.totalorder %s235_s29, %s927_s23  ;;  %p930_p6 = scmp.lt.s32.totalorder %s928_s9, %s921_s16 }
  0x33   : > { %p925_p2 = pneg %p924_p1 }
  0x34   : > { %p931_p7 = por %p930_p6, %p929_p5 }
  0x36   : > { %p932_p10 = pnand %p931_p7, %p925_p2 }
  0x38   : > { %935 = shalt.err (!%p932_p10)
}
  0x39   : > { %809 = dma.hbm_to_vmem [thread:$0]  (!%p1196_p0), %s232_s17, 128, %s235_s29, %s223_s7  }
  0x3a   : > { %s263_s1 = scalar_lea.vmem [#allocation7], %s1189_s10  ;;  %s1082_s28 = smov [#allocation7]  }
  0x3b   : > { %s270_s22 = sshll.u32 %s263_s1, 4  ;;  %s954_s23 = sshll.u32 %s1082_s28, 4  ;;  %s271_s22 = int_to_ptr.vmem [resolvable:$true] %s270_s22  ;;  %s955_s23 = int_to_ptr.vmem [resolvable:$false] %s954_s23 }
  0x3c   : > { %s949_s15 = scalar_lea.vmem %s271_s22, 128  ;;  %s956_s14 = scalar_lea.vmem %s955_s23, 256 }
  0x3d   : > { %p950_p13 = scmp.ne.s32.totalorder %s271_s22, %s949_s15  ;;  %p957_p2 = scmp.lt.s32.totalorder %s271_s22, %s955_s23 }
  0x3e   : > { %p958_p5 = scmp.lt.s32.totalorder %s956_s14, %s949_s15 }
  0x3f   : > { %p952_p12 = pnand %p950_p13, %p882_p3 }
  0x40   : > { %p959_p6 = por %p958_p5, %p957_p2 }
  0x41   : > { %p953_p1 = pneg %p952_p12 }
  0x43   : > { %p960_p7 = pnand %p959_p6, %p953_p1 }
  0x45   : > { %963 = shalt.err (!%p960_p7)
}
  0x46   : > { %815 = dma.hbm_to_vmem [thread:$0]  (!%p1196_p0), %s268_s26, 128, %s271_s22, %s1208_s27  }
  0x47   : > { %289 = sbr.rel (%p1222_p4) target bundleno = 808 (0x328), region = 36  ;;  %s1257_s17 = sand.u32 (!%p1222_p4), 1, %s1062_s19  }
  0x48   : > { %s1260_s29 = sshll.u32 (!%p1222_p4), %s1257_s17, 3  ;;  %s292_s12 = scalar_lea.sflag (!%p1222_p4), [#allocation3], %s1257_s17 }
  0x49   : > { %s295_s16 = scalar_lea.vmem (!%p1222_p4), [#allocation2], %s1260_s29 }
  0x4c   : > { %1041 = dma.done.wait (%p1169_p8), %s292_s12, 128  }
  0x4d   : > { %1043 = vsyncadd (%p1169_p8), %s292_s12, 4294967168  ;;  %s300_s26 = sand.u32 1, %s1149_s24   ;;  %s304_s27 = scalar_lea.vmem [#allocation5], %s1260_s29 }
  0x4e   : > { %s301_s11 = scalar_lea.sflag [#allocation6], %s300_s26 }
  0x4f   : > { %1045 = dma.done.wait (%p1169_p8), %s301_s11, 256  }
  0x50   : > { %1047 = vsyncadd (%p1169_p8), %s301_s11, 4294967040  ;;  %v1083_v0 = vmov 0.0   ;;  %vm1084_vm0 = vmmov 0   ;;  %vm374_vm1 = vcmask 261120   ;;  %v373_v1 = vld [vmem:[%s304_s27] sm:$0xff]  ;;  %v371_v2 = vld [vmem:[%s295_s16] sm:$0xff] }
  0x51   : > { %786 = vmatprep.subr.mxu0 %v1083_v0  ;;  %788 = vmatprep.mubr.msk.f32.mxu0 %vm1084_vm0, %v1083_v0  ;;  %v372_v3 = vmul.f32 0.17677669, %v371_v2  ;;  %p362_p0 = scmp.lt.s32.totalorder %s1070_s21, 1  ;;  %v1085_v5 = vmov 0   ;;  %vm457_vm4 = vcmask 64512   ;;  %s313_s1 = scalar_lea.vmem [#allocation7], %s1260_s29 }
  0x52   : > { %791 = vmatprep.subr.mxu1 %v1083_v0  ;;  %793 = vmatprep.mubr.msk.f32.mxu1 %vm1084_vm0, %v1083_v0  ;;  %v475_v17 = vld [vmem:[%s313_s1] sm:$0xff]  ;;  %s361_s22 = scalar_lea.vmem [#allocation9], %s1260_s29  ;;  %s778_s15 = sshll.u32 %s1070_s21, 7 }
  0x53   : > { %787 = vmatpush3.xpose.msk.msra.mxu0 %vm374_vm1, %v373_v1  ;;  %s363_s24 = scalar_select %p362_p0, %s1070_s21, 1  ;;  %792 = vmatpush3.msra.mxu1 %v475_v17 }
  0x54   : > { %s583_s14 = scalar_lea.hbm %s1366_s5, %s778_s15  ;;  %s585_s7 = sshll.u32 %s361_s22, 4  ;;  %s586_s7 = int_to_ptr.vmem [resolvable:$true] %s585_s7 }
  0x55   : > { %s772_s30 = sshll.u32 %s363_s24, 1  ;;  %s557_s10 = scalar_lea.sflag [#allocation10], %s1257_s17 }
  0x56   : > { %789 = vmatmul.mubr.msk.f32.vlgmr.msra.gmra.mxu0 %vm374_vm1, %v372_v3  ;;  %s368_s9 = scalar_lea.vmem %s1364_s3, %s772_s30  ;;  %s964_s12 = scalar_lea.vmem %s586_s7, 128 }
  0x57   : > { %v451_v4 = vld [vmem:[%s368_s9] sm:$0x3]  ;;  %p965_p8 = scmp.ne.s32.totalorder %s586_s7, %s964_s12  ;;  %s1086_s16 = smov [#allocation9]  }
  0x58   : > { %vm452_vm2 = vnez %v451_v4  ;;  %s968_s26 = sshll.u32 %s1086_s16, 4  ;;  %s969_s26 = int_to_ptr.vmem [resolvable:$false] %s968_s26 }
  0x59   : > { %v453_v6 = vsel %vm452_vm2, 16843009, %v1085_v5  ;;  %p966_p3 = pnand %p965_p8, %p1173_p9  ;;  %s970_s11 = scalar_lea.vmem %s969_s26, 256 }
  0x5a   : > { %v454_v7 = vunpack.c.0.s8 %v453_v6  ;;  %p971_p10 = scmp.lt.s32.totalorder %s586_s7, %s969_s26  ;;  %p972_p13 = scmp.lt.s32.totalorder %s970_s11, %s964_s12 }
  0x5b   : > { %p967_p4 = pneg %p966_p3 }
  0x5c   : > { %vm455_vm3 = vcmp.ne.s32.totalorder %v454_v7, 0  ;;  %p973_p12 = por %p972_p13, %p971_p10 }
  0x5e   : > { %p974_p1 = pnand %p973_p12, %p967_p4 }
 0x116   : > { %v447_v8 = vpop.f32.mrf.mxu0 }
 0x117   : > { %v456_v9 = vsel %vm455_vm3, -1e+30, %v447_v8 }
 0x118   : > { %v790_v10 = vpop.f32.mrf.mxu0  ;;  %v458_v11 = vsel %vm457_vm4, %v456_v9, -inf }
 0x119   : > { %459 = vmax.xlane.f32.xlu0 %v458_v11 }
 0x1a2   : > { %v460_v12 = vpop.xlane.xlu0 %459 }
 0x1a3   : > { %v461_v13 = vsub.f32 %v456_v9, %v460_v12  ;;  %vm472_vm5 = vcmp.le.f32.partialorder %v460_v12, -5e+29 }
 0x1a5   : > { %v462_v14 = vmul.f32 1.442695, %v461_v13 }
 0x1a7   : > { %876 = vpow2.f32 %v462_v14 }
 0x1b4   : > { %v877_v15 = vpop.eup %876 }
 0x1b5   : > { %v464_v16 = vsel %vm457_vm4, %v877_v15, 0.0 }
 0x1b6   : > { %465 = vadd.xlane.f32.xlu0 %v464_v16 }
 0x23f   : > { %v466_v18 = vpop.xlane.xlu0 %465 }
 0x240   : > { %v467_v19 = vmax.f32 %v466_v18, 1e-30 }
 0x242   : > { %878 = vrcp.f32 %v467_v19 }
 0x24f   : > { %v879_v20 = vpop.eup %878 }
 0x250   : > { %v469_v21 = vmul.f32 %v879_v20, %v467_v19 }
 0x252   : > { %v470_v22 = vsub.f32 2.0, %v469_v21 }
 0x254   : > { %v471_v23 = vmul.f32 %v879_v20, %v470_v22 }
 0x256   : > { %v473_v24 = vsel %vm472_vm5, 0.0, %v471_v23 }
 0x257   : > { %v474_v25 = vmul.f32 %v877_v15, %v473_v24 }
 0x259   : > { %794 = vmatmul.mubr.msk.f32.vlgmr.msra.gmra.mxu1 %vm457_vm4, %v474_v25  ;;  %549 = vst.msk [vmem:[%s361_s22] sm:$0xff] %vm457_vm4, %v474_v25 }
 0x25a   : > { %977 = shalt.err (!%p974_p1)
}
 0x25b   : > { %s978_s27 = scalar_lea.hbm %s583_s14, 128  ;;  %s982_s13 = scalar_lea.hbm %s1366_s5, 256 }
 0x25c   : > { %p979_p2 = scmp.ne.s32.totalorder %s583_s14, %s978_s27  ;;  %p983_p7 = scmp.lt.s32.totalorder %s583_s14, %s1366_s5 }
 0x25d   : > { %p984_p0 = scmp.lt.s32.totalorder %s982_s13, %s978_s27 }
 0x25e   : > { %p980_p5 = pnand %p979_p2, %p1173_p9 }
 0x25f   : > { %p985_p8 = por %p984_p0, %p983_p7 }
 0x260   : > { %p981_p6 = pneg %p980_p5 }
 0x262   : > { %p986_p3 = pnand %p985_p8, %p981_p6 }
 0x264   : > { %989 = shalt.err (!%p986_p3)
}
 0x265   : > { %803 = dma.vmem_to_hbm [thread:$0]  (%p1173_p9), %s586_s7, 128, %s583_s14, %s557_s10  }
 0x266   : > { %s354_s1 = scalar_lea.vmem [#allocation8], %s1260_s29  ;;  %s1312_s12 = scalar_lea.hbm %s1365_s4, %s778_s15 }
 0x267   : > { %s571_s22 = sshll.u32 %s354_s1, 4  ;;  %s552_s16 = scalar_lea.sflag [#allocation4], %s1257_s17  ;;  %s1314_s22 = int_to_ptr.vmem [resolvable:$true] %s571_s22 }
 0x268   : > { %s990_s26 = scalar_lea.vmem %s1314_s22, 128  ;;  %s1087_s21 = smov [#allocation8]  }
 0x269   : > { %p991_p4 = scmp.ne.s32.totalorder %s1314_s22, %s990_s26  ;;  %s994_s29 = sshll.u32 %s1087_s21, 4  ;;  %s995_s29 = int_to_ptr.vmem [resolvable:$false] %s994_s29 }
 0x26a   : > { %s996_s15 = scalar_lea.vmem %s995_s29, 256  ;;  %p997_p12 = scmp.lt.s32.totalorder %s1314_s22, %s995_s29 }
 0x26b   : > { %p992_p10 = pnand %p991_p4, %p1173_p9  ;;  %p998_p1 = scmp.lt.s32.totalorder %s996_s15, %s990_s26 }
 0x26d   : > { %p993_p13 = pneg %p992_p10  ;;  %p999_p2 = por %p998_p1, %p997_p12 }
 0x26f   : > { %p1000_p5 = pnand %p999_p2, %p993_p13 }
 0x319   : > { %v545_v26 = vpop.f32.mrf.mxu1 }
 0x31a   : > { %550 = vst.msk [vmem:[%s354_s1] sm:$0xff] %vm374_vm1, %v545_v26 }
 0x31b   : > { %v795_v27 = vpop.f32.mrf.mxu1 }
 0x31c   : > { %1003 = shalt.err (!%p1000_p5)
}
 0x31d   : > { %s1004_s14 = scalar_lea.hbm %s1312_s12, 128  ;;  %s1008_s10 = scalar_lea.hbm %s1365_s4, 256 }
 0x31e   : > { %p1005_p6 = scmp.ne.s32.totalorder %s1312_s12, %s1004_s14  ;;  %p1009_p8 = scmp.lt.s32.totalorder %s1312_s12, %s1365_s4 }
 0x31f   : > { %p1010_p3 = scmp.lt.s32.totalorder %s1008_s10, %s1004_s14 }
 0x320   : > { %p1006_p7 = pnand %p1005_p6, %p1173_p9 }
 0x321   : > { %p1011_p4 = por %p1010_p3, %p1009_p8 }
 0x322   : > { %p1007_p0 = pneg %p1006_p7 }
 0x324   : > { %p1012_p10 = pnand %p1011_p4, %p1007_p0 }
 0x326   : > { %1015 = shalt.err (!%p1012_p10)
}
 0x327   : > { %802 = dma.vmem_to_hbm [thread:$0]  (%p1173_p9), %s1314_s22, 128, %s1312_s12, %s552_s16  }
 0x328 PF: > { %s1385_s24 = sld [smem:[#allocation16_spill]]  ;;  %s597_s30 = sand.u32 1, %s1058_s18  }
 0x329   : > { %s598_s13 = scalar_lea.sflag [#allocation4], %s597_s30 }
 0x32e   : > { %p1386_p13 = scmp.ge.s32.totalorder %s1385_s24, 2 }
 0x330   : > { %p817_p12 = pnand %p1386_p13, %p1180_p11 }
 0x332   : > { %p818_p1 = pneg %p817_p12 }
 0x334   : > { %1049 = dma.done.wait (%p818_p1), %s598_s13, 128  }
 0x335   : > { %1051 = vsyncadd (%p818_p1), %s598_s13, 4294967168  ;;  %s607_s25 = scalar_lea.sflag [#allocation10], %s597_s30 }
 0x336   : > { %1053 = dma.done.wait (%p818_p1), %s607_s25, 128  }
 0x337   : > { %1055 = vsyncadd (%p818_p1), %s607_s25, 4294967168  ;;  %s28_s23 = sadd.s32 1, %s1385_s24   ;;  %s1387_s6 = sld [smem:[#allocation18_spill]] }
 0x338   : > { %p25_p2 = scmp.ge.s32.totalorder %s28_s23, 4   ;;  %s1388_s21 = sld [smem:[#allocation15_spill]] }
 0x339   : > { %s1389_s22 = sld [smem:[#allocation17_spill]]  ;;  %s1390_s18 = smov %s1062_s19 }
 0x33a   : > { %s1391_s19 = smov %s1066_s20  ;;  %27 = sbr.rel (!%p25_p2) target bundleno = 12 (0xc), region = 125 }
 0x33d   : > { %s1392_s20 = smov %s1387_s6 }
 0x33f   :  { %612 = vsyncpa [#allocation3], 1 }
 0x340   :  { %614 = vsyncpa [#allocation3 + $0x1], 1 }
 0x341   :  { %615 = vsyncpa [#allocation6], 1 }
 0x342   :  { %617 = vsyncpa [#allocation6 + $0x1], 1 }
 0x343   :  { %618 = vsyncpa [#allocation4], 1 }
 0x344   :  { %620 = vsyncpa [#allocation4 + $0x1], 1 }
 0x345   :  { %621 = vsyncpa [#allocation10], 1 }
 0x346   :  { %623 = vsyncpa [#allocation10 + $0x1], 1 }

</bundles_post_ra>
